<compile_context>
chip_gen: v7x
topology: tpu7x:2x2x1
jax: 0.10.0
libtpu: 0.0.40
codegen_flags: <defaults>
</compile_context>

<pallas_src>
import functools

import jax
import jax.numpy as jnp
from jax.experimental import pallas as pl
from jax.experimental.pallas import tpu as pltpu


_VMEM_LIMIT = 48 * 1024 * 1024      # safe on v5e/v6e (128 MiB) and v7x (64 MiB)

_DN = (((1,), (1,)), ((), ()))      # contract dim-1 of both operands (x @ W.T)
_DN_NT = (((1,), (0,)), ((), ()))   # standard (M,K) @ (K,N)


# ----------------------------- tile helpers ---------------------------------

def _pick_tile(dim, pref, align):
    """Largest multiple of `align` <= pref that divides dim, else full dim."""
    t = min(pref, dim)
    t -= t % align
    while t >= align:
        if dim % t == 0:
            return t
        t -= align
    return dim


# ----------------------------- linear (tiled) --------------------------------

def _linear_kernel(x_ref, w_ref, o_ref, acc_ref):
    k = pl.program_id(2)

    @pl.when(k == 0)
    def _():
        acc_ref[...] = jnp.zeros_like(acc_ref)

    acc_ref[...] += jax.lax.dot_general(
        x_ref[...].astype(jnp.bfloat16), w_ref[...],
        _DN, preferred_element_type=jnp.float32)

    @pl.when(k == pl.num_programs(2) - 1)
    def _():
        o_ref[...] = acc_ref[...].astype(o_ref.dtype)


def linear(x, w, out_dtype=jnp.float32, tm_pref=256, tn_pref=512, tk_pref=1024):
    m, k = x.shape
    n = w.shape[0]
    tm = _pick_tile(m, tm_pref, 16)     # 16-aligned for bf16 sublane packing
    tn = _pick_tile(n, tn_pref, 128)
    tk = _pick_tile(k, tk_pref, 128)
    return pl.pallas_call(
        _linear_kernel,
        out_shape=jax.ShapeDtypeStruct((m, n), out_dtype),
        grid=(m // tm, n // tn, k // tk),
        in_specs=[pl.BlockSpec((tm, tk), lambda i, j, kk: (i, kk)),
                  pl.BlockSpec((tn, tk), lambda i, j, kk: (j, kk))],
        out_specs=pl.BlockSpec((tm, tn), lambda i, j, kk: (i, j)),
        scratch_shapes=[pltpu.VMEM((tm, tn), jnp.float32)],
        compiler_params=pltpu.CompilerParams(
            dimension_semantics=("parallel", "parallel", "arbitrary"),
            vmem_limit_bytes=_VMEM_LIMIT),
    )(x, w)


# ------------------------ fused residual-add RMSNorm -------------------------

def _rmsnorm_kernel(eps, x_ref, res_ref, w_ref, o_ref, res_o_ref):
    x = x_ref[...].astype(jnp.float32) + res_ref[...].astype(jnp.float32)
    res_o_ref[...] = x
    var = jnp.mean(x * x, axis=-1, keepdims=True)
    o_ref[...] = (x * jax.lax.rsqrt(var + eps) * w_ref[...]).astype(o_ref.dtype)


def rmsnorm(x, residual, weight, eps):
    t, h = x.shape
    tm = _pick_tile(t, 256, 8)
    w2d = weight.reshape(1, h)
    kern = functools.partial(_rmsnorm_kernel, eps)
    return pl.pallas_call(
        kern,
        out_shape=(jax.ShapeDtypeStruct((t, h), jnp.bfloat16),   # normed
                   jax.ShapeDtypeStruct((t, h), jnp.float32)),   # new residual
        grid=(t // tm,),
        in_specs=[pl.BlockSpec((tm, h), lambda i: (i, 0)),
                  pl.BlockSpec((tm, h), lambda i: (i, 0)),
                  pl.BlockSpec((1, h), lambda i: (0, 0))],
        out_specs=(pl.BlockSpec((tm, h), lambda i: (i, 0)),
                   pl.BlockSpec((tm, h), lambda i: (i, 0))),
        compiler_params=pltpu.CompilerParams(dimension_semantics=("parallel",)),
    )(x, residual, w2d)


# ---------------------- flash-style causal attention --------------------------
# Query heads sharing a KV head are packed into one block: q is (nkv, rep, S, D)
# and the grid iterates over KV groups, so K/V stream from HBM once per group.

def _attn_kernel(tq, tks, rep, q_ref, k_ref, v_ref, o_ref, m_sc, l_sc, acc_sc):
    qi = pl.program_id(1)
    ki = pl.program_id(2)
    row0 = qi * tq
    col0 = ki * tks

    @pl.when(ki == 0)
    def _():
        m_sc[...] = jnp.full_like(m_sc, -jnp.inf)
        l_sc[...] = jnp.zeros_like(l_sc)
        acc_sc[...] = jnp.zeros_like(acc_sc)

    q = q_ref[...].reshape(rep * tq, q_ref.shape[-1])       # (rep*tq, d) bf16

    def scores():
        return jax.lax.dot_general(q, k_ref[...], _DN,
                                   preferred_element_type=jnp.float32)

    def update(s):
        m_prev = m_sc[...]
        m_new = jnp.maximum(m_prev, jnp.max(s, axis=-1, keepdims=True))
        alpha = jnp.exp(m_prev - m_new)
        p = jnp.exp(s - m_new)
        l_sc[...] = alpha * l_sc[...] + jnp.sum(p, axis=-1, keepdims=True)
        acc_sc[...] = alpha * acc_sc[...] + jax.lax.dot_general(
            p.astype(jnp.bfloat16), v_ref[...], _DN_NT,
            preferred_element_type=jnp.float32)
        m_sc[...] = m_new

    # Fully-below-diagonal kv tiles: no masking VALU work at all.
    @pl.when(col0 + tks - 1 <= row0)
    def _():
        update(scores())

    # Diagonal kv tiles: build and apply the causal mask.
    @pl.when((col0 < row0 + tq) & (col0 + tks - 1 > row0))
    def _():
        s = scores()
        rows = row0 + (jax.lax.broadcasted_iota(jnp.int32, (rep * tq, tks), 0) % tq)
        cols = col0 + jax.lax.broadcasted_iota(jnp.int32, (rep * tq, tks), 1)
        update(jnp.where(cols <= rows, s, -1e30))

    @pl.when(ki == pl.num_programs(2) - 1)
    def _():
        o = acc_sc[...] / l_sc[...]                  # exact final normalization
        o_ref[...] = o.reshape(o_ref.shape).astype(o_ref.dtype)


def attention(q, k, v, tq_pref=256, tk_pref=512):
    # q: (nkv, rep, S, D) bf16 (softmax scale folded in); k, v: (nkv, S, D) bf16.
    nkv, rep, s, d = q.shape
    tq = _pick_tile(s, tq_pref, 8)
    tks = _pick_tile(s, tk_pref, 8)
    kern = functools.partial(_attn_kernel, tq, tks, rep)

    def kv_map(g, qi, ki):
        # Clamp: never DMA kv tiles entirely above the causal diagonal; the
        # already-resident block is reused and compute is skipped in-kernel.
        return (g, jnp.minimum(ki, ((qi + 1) * tq - 1) // tks), 0)

    return pl.pallas_call(
        kern,
        out_shape=jax.ShapeDtypeStruct((nkv, rep, s, d), jnp.bfloat16),
        grid=(nkv, s // tq, s // tks),
        in_specs=[pl.BlockSpec((None, rep, tq, d), lambda g, qi, ki: (g, 0, qi, 0)),
                  pl.BlockSpec((None, tks, d), kv_map),
                  pl.BlockSpec((None, tks, d), kv_map)],
        out_specs=pl.BlockSpec((None, rep, tq, d), lambda g, qi, ki: (g, 0, qi, 0)),
        scratch_shapes=[pltpu.VMEM((rep * tq, 1), jnp.float32),
                        pltpu.VMEM((rep * tq, 1), jnp.float32),
                        pltpu.VMEM((rep * tq, d), jnp.float32)],
        compiler_params=pltpu.CompilerParams(
            dimension_semantics=("parallel", "parallel", "arbitrary"),
            vmem_limit_bytes=_VMEM_LIMIT),
    )(q, k, v)


# ------------------------------ fused MoE -------------------------------------
# Shared experts are folded in as always-on experts (gate=1, count=T), placed
# first so expert 0 is never empty.  Correctness of the dense formulation relies
# on routed gates being exactly 0.0 for non-selected (token, expert) pairs.

def _moe_kernel(counts_ref, nz_ref, x_ref, wg_ref, wu_ref, w2_ref, g_ref,
                o_ref, acc_ref):
    ee = pl.program_id(1)
    ii = pl.program_id(2)

    @pl.when((ee == 0) & (ii == 0))
    def _():
        acc_ref[...] = jnp.zeros_like(acc_ref)

    # Experts with no routed tokens skip all MXU work; their weight DMA is also
    # skipped via the data-dependent index_maps (block index frozen).
    @pl.when(counts_ref[ee] > 0)
    def _():
        x = x_ref[...].astype(jnp.bfloat16)
        gate = jax.lax.dot_general(x, wg_ref[...], _DN,
                                   preferred_element_type=jnp.float32)
        up = jax.lax.dot_general(x, wu_ref[...], _DN,
                                 preferred_element_type=jnp.float32)
        act = (gate * jax.nn.sigmoid(gate)) * up * g_ref[...]   # f32, (tm, tci)
        acc_ref[...] += jax.lax.dot_general(
            act.astype(jnp.bfloat16), w2_ref[...], _DN,
            preferred_element_type=jnp.float32)

    @pl.when((ee == pl.num_programs(1) - 1) & (ii == pl.num_programs(2) - 1))
    def _():
        o_ref[...] = acc_ref[...].astype(o_ref.dtype)


def fused_moe(counts, nz_map, x, wg, wu, w2, gates, tm_pref=512, tci_pref=512):
    # x: (T,H); wg/wu: (E',I,H); w2: (E',H,I); gates: (E',T,1); counts/nz: (E',)
    t, h = x.shape
    e_total, inter, _ = wg.shape
    tm = _pick_tile(t, tm_pref, 16)
    tci = _pick_tile(inter, tci_pref, 128)
    n_ii = inter // tci
    last_ii = n_ii - 1

    def _gated(ee, ii, counts_ref, nz_ref):
        has = counts_ref[ee] > 0
        e_idx = jnp.where(has, ee, nz_ref[ee])     # previous non-empty expert
        i_idx = jnp.where(has, ii, last_ii)        # ... and its last-resident tile
        return e_idx, i_idx

    def w1_map(tt, ee, ii, counts_ref, nz_ref):
        e_idx, i_idx = _gated(ee, ii, counts_ref, nz_ref)
        return (e_idx, i_idx, 0)

    def w2_map(tt, ee, ii, counts_ref, nz_ref):
        e_idx, i_idx = _gated(ee, ii, counts_ref, nz_ref)
        return (e_idx, 0, i_idx)

    grid_spec = pltpu.PrefetchScalarGridSpec(
        num_scalar_prefetch=2,
        grid=(t // tm, e_total, n_ii),
        in_specs=[
            pl.BlockSpec((tm, h), lambda tt, ee, ii, c, z: (tt, 0)),
            pl.BlockSpec((None, tci, h), w1_map),
            pl.BlockSpec((None, tci, h), w1_map),
            pl.BlockSpec((None, h, tci), w2_map),
            pl.BlockSpec((None, tm, 1), lambda tt, ee, ii, c, z: (ee, tt, 0)),
        ],
        out_specs=pl.BlockSpec((tm, h), lambda tt, ee, ii, c, z: (tt, 0)),
        scratch_shapes=[pltpu.VMEM((tm, h), jnp.float32)],
    )
    return pl.pallas_call(
        _moe_kernel,
        out_shape=jax.ShapeDtypeStruct((t, h), jnp.bfloat16),
        grid_spec=grid_spec,
        compiler_params=pltpu.CompilerParams(
            dimension_semantics=("parallel", "arbitrary", "arbitrary"),
            vmem_limit_bytes=_VMEM_LIMIT),
    )(counts, nz_map, x, wg, wu, w2, gates)


# ------------------------------- JAX glue -------------------------------------

def apply_rope(x, positions, head_dim, base):
    half = head_dim // 2
    inv_freq = 1.0 / (base ** (jnp.arange(half, dtype=jnp.float32) / half))
    freqs = positions[:, None].astype(jnp.float32) * inv_freq[None, :]   # (T, half)
    cos = jnp.cos(freqs)[:, None, :]
    sin = jnp.sin(freqs)[:, None, :]
    x1 = x[..., :half].astype(jnp.float32)
    x2 = x[..., half:].astype(jnp.float32)
    return jnp.concatenate([x1 * cos - x2 * sin, x2 * cos + x1 * sin], axis=-1)


def attention_layer(p, positions, hidden, cfg):
    t, h = hidden.shape
    nh = cfg["num_attention_heads"]
    nkv = cfg["num_key_value_heads"]
    hd = h // nh
    rep = nh // nkv
    q_size = nh * hd
    kv_size = nkv * hd
    scale = hd ** -0.5

    qkv = linear(hidden, p["qkv_w"], out_dtype=jnp.bfloat16)     # (T, q+2kv)
    q = qkv[:, :q_size].reshape(t, nh, hd)
    k = qkv[:, q_size:q_size + kv_size].reshape(t, nkv, hd)
    v = qkv[:, q_size + kv_size:].reshape(t, nkv, hd)

    # TODO(synk): RoPE + scale + head split/transpose could be fused into the
    # qkv epilogue / attention prologue (pltpu.roll for rotate-half) to remove
    # these (T,H)-sized layout round trips; kept as plain-JAX elementwise here.
    q = (apply_rope(q, positions, hd, cfg["rope_theta"]) * scale).astype(jnp.bfloat16)
    k = apply_rope(k, positions, hd, cfg["rope_theta"]).astype(jnp.bfloat16)
    v = v.astype(jnp.bfloat16)

    # Pack the `rep` query heads of each KV group: (nkv, rep, T, hd).
    qh = q.reshape(t, nkv, rep, hd).transpose(1, 2, 0, 3)
    kh = k.transpose(1, 0, 2)                 # (nkv, T, hd) -- no GQA repeat
    vh = v.transpose(1, 0, 2)
    o = attention(qh, kh, vh)                 # (nkv, rep, T, hd) bf16
    o = o.transpose(2, 0, 1, 3).reshape(t, nh * hd)
    return linear(o, p["o_w"], out_dtype=jnp.bfloat16)


def moe_layer(p, hidden, cfg):
    t, h = hidden.shape
    e = cfg["num_experts"]
    ns = cfg.get("num_shared_experts") or 0

    router_logits = linear(hidden, p["router_w"], out_dtype=jnp.float32)  # (T, E)
    probs = jax.nn.softmax(router_logits, axis=-1)
    topk_vals, topk_idx = jax.lax.top_k(probs, cfg["moe_top_k"])
    if cfg.get("norm_topk_prob", False):
        topk_vals = topk_vals / jnp.sum(topk_vals, axis=-1, keepdims=True)

    gates = jnp.zeros((t, e), jnp.float32)
    gates = gates.at[jnp.arange(t)[:, None], topk_idx].set(topk_vals)
    counts = jnp.zeros((e,), jnp.int32).at[topk_idx.reshape(-1)].add(1)

    # Shared experts fold in as `ns` always-on experts (gate=1, count=T), first.
    gates_all = jnp.concatenate([jnp.ones((t, ns), jnp.float32), gates],
                                axis=-1).T[:, :, None]            # (E', T, 1)
    counts_all = jnp.concatenate([jnp.full((ns,), t, jnp.int32), counts])
    e_total = ns + e
    idx = jnp.arange(e_total, dtype=jnp.int32)
    nz_map = jnp.maximum(
        jax.lax.cummax(jnp.where(counts_all > 0, idx, -1), axis=0), 0
    ).astype(jnp.int32)

    # TODO(synk): true token grouping (sort tokens by expert + data-dependent x
    # index_map) would cut MoE FLOPs by ~E/top_k; kept dense-with-skips here.
    routed_plus_shared = fused_moe(counts_all, nz_map, hidden,
                                   p["wg_all"], p["wu_all"], p["w2_all"],
                                   gates_all)
    # tensor_model_parallel_all_reduce: tp=1 -> no-op
    return routed_plus_shared


def decoder_layer(p, positions, hidden, residual, cfg):
    normed, residual = rmsnorm(hidden, residual, p["input_ln"], cfg["rms_norm_eps"])
    attn_out = attention_layer(p, positions, normed, cfg)
    normed, residual = rmsnorm(attn_out, residual, p["post_ln"], cfg["rms_norm_eps"])
    mlp_out = moe_layer(p, normed, cfg)
    return mlp_out, residual


def model_forward(params, input_ids, positions, cfg):
    # TODO(synk): embedding lookup is a gather; kept in JAX (no clean Pallas gather).
    hidden = jnp.take(params["embed"], input_ids, axis=0)          # bf16 (T, H)
    residual = jnp.zeros(hidden.shape, jnp.float32)
    for lp in params["layers"]:
        hidden, residual = decoder_layer(lp, positions, hidden, residual, cfg)
    hidden, _ = rmsnorm(hidden, residual, params["final_ln"], cfg["rms_norm_eps"])
    # LogitsProcessor: next-token logits for the last token of the sequence.
    logits = linear(hidden[-1:, :], params["lm_head"], out_dtype=jnp.float32)
    return logits


# ----------------------------- parameter init ---------------------------------

def init_params(key, cfg):
    h = cfg["hidden_size"]
    nh = cfg["num_attention_heads"]
    nkv = cfg["num_key_value_heads"]
    hd = h // nh
    inter = cfg["intermediate_size"]
    e = cfg["num_experts"]
    ns = cfg.get("num_shared_experts") or 0
    shared_inter = inter * ns
    v = cfg["vocab_size"]

    keys = iter(jax.random.split(key, 4 + 12 * cfg["num_hidden_layers"]))

    def nrm(shape, scale=0.02):
        return (scale * jax.random.normal(next(keys), shape,
                                          dtype=jnp.float32)).astype(jnp.bfloat16)

    params = {
        "embed": nrm((v, h)),
        "lm_head": nrm((v, h)),
        "final_ln": jnp.ones((h,), jnp.float32),
        "layers": [],
    }
    for _ in range(cfg["num_hidden_layers"]):
        wg = nrm((e, inter, h))            # per-expert gate_proj
        wu = nrm((e, inter, h))            # per-expert up_proj
        w2 = nrm((e, h, inter))            # per-expert down_proj
        if ns:
            shared_wg = nrm((shared_inter, h))
            shared_wu = nrm((shared_inter, h))
            shared_w2 = nrm((h, shared_inter))
            # Pack shared experts as `ns` extra experts in front (exact split).
            wg_all = jnp.concatenate([shared_wg.reshape(ns, inter, h), wg], 0)
            wu_all = jnp.concatenate([shared_wu.reshape(ns, inter, h), wu], 0)
            w2_all = jnp.concatenate(
                [shared_w2.reshape(h, ns, inter).transpose(1, 0, 2), w2], 0)
        else:
            wg_all, wu_all, w2_all = wg, wu, w2
        layer = {
            "input_ln": jnp.ones((h,), jnp.float32),
            "post_ln": jnp.ones((h,), jnp.float32),
            "qkv_w": nrm(((nh + 2 * nkv) * hd, h)),
            "o_w": nrm((h, nh * hd)),
            "router_w": nrm((e, h)),
            "wg_all": wg_all,
            "wu_all": wu_all,
            "w2_all": w2_all,
        }
        params["layers"].append(layer)
    return params


# ---------------------------------- main ---------------------------------------

if __name__ == "__main__":
    cfg = dict(
        vocab_size=256,
        hidden_size=128,
        num_attention_heads=4,
        num_key_value_heads=2,
        intermediate_size=64,
        num_experts=4,
        moe_top_k=2,
        num_shared_experts=2,
        num_hidden_layers=2,
        rms_norm_eps=1e-6,
        rope_theta=10000.0,
        norm_topk_prob=False,
    )

    root = jax.random.PRNGKey(0)
    k_params, k_ids = jax.random.split(root)
    params = init_params(k_params, cfg)

    seq_len = 8
    input_ids = jax.random.randint(k_ids, (seq_len,), 0, cfg["vocab_size"],
                                   dtype=jnp.int32)
    positions = jnp.arange(seq_len, dtype=jnp.int32)

    logits = model_forward(params, input_ids, positions, cfg)
    jax.block_until_ready(logits)
    assert logits.shape == (1, cfg["vocab_size"])
    assert bool(jnp.all(jnp.isfinite(logits)))
    print("KERNEL_OK")
</pallas_src>

<mosaic_0001>
module attributes {stable_mosaic.version = 11 : i64} {
  func.func @_rmsnorm_kernel(%arg0: i32, %arg1: memref<8x128xbf16, #tpu.memory_space<vmem>>, %arg2: memref<8x128xf32, #tpu.memory_space<vmem>>, %arg3: memref<1x128xf32, #tpu.memory_space<vmem>>, %arg4: memref<8x128xbf16, #tpu.memory_space<vmem>>, %arg5: memref<8x128xf32, #tpu.memory_space<vmem>>) attributes {dimension_semantics = [#tpu.dimension_semantics<parallel>], iteration_bounds = array<i64: 1>, scalar_prefetch = 0 : i64, scratch_operands = 0 : i64, tpu.core_type = #tpu.core_type<tc>, window_params = [{transform_indices = @transform_0, window_bounds = array<i64: 8, 128>}, {transform_indices = @transform_1, window_bounds = array<i64: 8, 128>}, {pipeline_mode = #tpu.pipeline_mode<synchronous>, transform_indices = @transform_2, window_bounds = array<i64: 1, 128>}, {transform_indices = @transform_3, window_bounds = array<i64: 8, 128>}, {transform_indices = @transform_4, window_bounds = array<i64: 8, 128>}]} {
    %c0 = arith.constant 0 : index
    %c0_0 = arith.constant 0 : index
    %0 = vector.load %arg1[%c0, %c0_0] : memref<8x128xbf16, #tpu.memory_space<vmem>>, vector<8x128xbf16>
    %1 = arith.extf %0 : vector<8x128xbf16> to vector<8x128xf32>
    %c0_1 = arith.constant 0 : index
    %c0_2 = arith.constant 0 : index
    %2 = vector.load %arg2[%c0_1, %c0_2] : memref<8x128xf32, #tpu.memory_space<vmem>>, vector<8x128xf32>
    %3 = arith.addf %1, %2 : vector<8x128xf32>
    %c0_3 = arith.constant 0 : index
    %c0_4 = arith.constant 0 : index
    %4 = vector.load %arg5[%c0_3, %c0_4] : memref<8x128xf32, #tpu.memory_space<vmem>>, vector<8x128xf32>
    tpu.vector_store %arg5[%c0_3, %c0_4], %3 {strides = array<i32>} : memref<8x128xf32, #tpu.memory_space<vmem>>, vector<8x128xf32>,
    %5 = arith.mulf %3, %3 : vector<8x128xf32>
    %cst = arith.constant dense<0.000000e+00> : vector<8xf32>
    %6 = vector.multi_reduction <add>, %5, %cst [1] : vector<8x128xf32> to vector<8xf32>
    %7 = vector.shape_cast %6 : vector<8xf32> to vector<8x1xf32>
    %cst_5 = arith.constant 1.280000e+02 : f32
    %8 = vector.broadcast %cst_5 : f32 to vector<8x1xf32>
    %9 = arith.divf %7, %8 : vector<8x1xf32>
    %cst_6 = arith.constant 9.99999997E-7 : f32
    %10 = vector.broadcast %cst_6 : f32 to vector<8x1xf32>
    %11 = arith.addf %9, %10 : vector<8x1xf32>
    %12 = math.rsqrt %11 : vector<8x1xf32>
    %13 = vector.broadcast %12 : vector<8x1xf32> to vector<8x128xf32>
    %14 = arith.mulf %3, %13 : vector<8x128xf32>
    %c0_7 = arith.constant 0 : index
    %c0_8 = arith.constant 0 : index
    %15 = vector.load %arg3[%c0_7, %c0_8] : memref<1x128xf32, #tpu.memory_space<vmem>>, vector<1x128xf32>
    %16 = vector.broadcast %15 : vector<1x128xf32> to vector<8x128xf32>
    %17 = arith.mulf %14, %16 : vector<8x128xf32>
    %18 = arith.truncf %17 : vector<8x128xf32> to vector<8x128xbf16>
    %c0_9 = arith.constant 0 : index
    %c0_10 = arith.constant 0 : index
    %19 = vector.load %arg4[%c0_9, %c0_10] : memref<8x128xbf16, #tpu.memory_space<vmem>>, vector<8x128xbf16>
    tpu.vector_store %arg4[%c0_9, %c0_10], %18 {strides = array<i32>} : memref<8x128xbf16, #tpu.memory_space<vmem>>, vector<8x128xbf16>,
    return
  }
  func.func @transform_0(%arg0: i32) -> (i32, i32) {
    %c0_i32 = arith.constant 0 : i32
    %c0_i32_0 = arith.constant 0 : i32
    return %arg0, %c0_i32 : i32, i32
  }
  func.func @transform_1(%arg0: i32) -> (i32, i32) {
    %c0_i32 = arith.constant 0 : i32
    %c0_i32_0 = arith.constant 0 : i32
    return %arg0, %c0_i32 : i32, i32
  }
  func.func @transform_2(%arg0: i32) -> (i32, i32) {
    %c0_i32 = arith.constant 0 : i32
    %c0_i32_0 = arith.constant 0 : i32
    %c0_i32_1 = arith.constant 0 : i32
    return %c0_i32, %c0_i32_0 : i32, i32
  }
  func.func @transform_3(%arg0: i32) -> (i32, i32) {
    %c0_i32 = arith.constant 0 : i32
    %c0_i32_0 = arith.constant 0 : i32
    return %arg0, %c0_i32 : i32, i32
  }
  func.func @transform_4(%arg0: i32) -> (i32, i32) {
    %c0_i32 = arith.constant 0 : i32
    %c0_i32_0 = arith.constant 0 : i32
    return %arg0, %c0_i32 : i32, i32
  }
}

</mosaic_0001>

<bundles_post_ra>
// kernel: tpu_custom_call.1
= control target key start
LH: loop header
LB: loop body
LE: loop exit
PB: predicated region body
PF: predicated region fallthrough
CT: control target
= control target key end

     0   :  { %10 = vsyncpa [#allocation3], 0  ;;  %s278_s0 = inlined_call_operand.hbm [shape: bf16[8,128], index: 0, kind: input, shape index: {}]   ;;  %s279_s1 = inlined_call_operand.hbm [shape: f32[8,128], index: 1, kind: input, shape index: {}]   ;;  %s280_s2 = inlined_call_operand.vmem [shape: f32[1,128], index: 2, kind: input, shape index: {}]   ;;  %s281_s3 = inlined_call_operand.hbm [shape: bf16[8,128], index: 3, kind: output, shape index: {0}]   ;;  %s282_s4 = inlined_call_operand.hbm [shape: f32[8,128], index: 4, kind: output, shape index: {1}]  }
   0x1   :  { %11 = vsyncpa [#allocation6], 0 }
   0x2   :  { %12 = vsyncpa [#allocation4], 0 }
   0x3   :  { %13 = vsyncpa [#allocation9], 0  ;;  %s198_s15 = smov [#allocation2]   ;;  %s199_s17 = smov [#allocation5]  }
   0x4   :  { %s20_s16 = sshll.u32 %s198_s15, 4  ;;  %s30_s18 = sshll.u32 %s199_s17, 4  ;;  %s21_s16 = int_to_ptr.vmem [resolvable:$true] %s20_s16  ;;  %s31_s18 = int_to_ptr.vmem [resolvable:$true] %s30_s18 }
   0x5   :  { %s102_s21 = scalar_lea.hbm %s278_s0, 64 }
   0x6   :  { %p103_p0 = scmp.ne.s32.totalorder %s278_s0, %s102_s21  ;;  %p106_p1 = scmp.lt.u32.totalorder %s102_s21, %s278_s0 }
   0x8   :  { %p108_p2 = pnand %p106_p1, %p103_p0 }
   0xa   :  { %111 = shalt.err (!%p108_p2)
}
   0xb   :  { %s112_s26 = scalar_lea.vmem %s21_s16, 64  ;;  %p117_p4 = scmp.lt.s32.totalorder %s21_s16, %s21_s16 }
   0xc   :  { %p113_p3 = scmp.ne.s32.totalorder %s21_s16, %s112_s26  ;;  %p118_p5 = scmp.lt.s32.totalorder %s112_s26, %s112_s26 }
   0xe   :  { %p119_p6 = por %p118_p5, %p117_p4 }
  0x10   :  { %p120_p7 = pnand %p119_p6, %p113_p3 }
  0x12   :  { %123 = shalt.err (!%p120_p7)
}
  0x13   :  { %23 = dma.hbm_to_vmem [thread:$0]  %s278_s0, 64, %s21_s16, [#allocation3]  }
  0x14   :  { %s124_s5 = scalar_lea.hbm %s279_s1, 128 }
  0x15   :  { %p125_p8 = scmp.ne.s32.totalorder %s279_s1, %s124_s5  ;;  %p128_p9 = scmp.lt.u32.totalorder %s124_s5, %s279_s1 }
  0x17   :  { %p130_p10 = pnand %p128_p9, %p125_p8 }
  0x19   :  { %133 = shalt.err (!%p130_p10)
}
  0x1a   :  { %s134_s10 = scalar_lea.vmem %s31_s18, 128  ;;  %p139_p12 = scmp.lt.s32.totalorder %s31_s18, %s31_s18 }
  0x1b   :  { %p135_p11 = scmp.ne.s32.totalorder %s31_s18, %s134_s10  ;;  %p140_p13 = scmp.lt.s32.totalorder %s134_s10, %s134_s10 }
  0x1d   :  { %p141_p0 = por %p140_p13, %p139_p12 }
  0x1f   :  { %p142_p1 = pnand %p141_p0, %p135_p11 }
  0x21   :  { %145 = shalt.err (!%p142_p1)
}
  0x22   :  { %33 = dma.hbm_to_vmem [thread:$0]  %s279_s1, 128, %s31_s18, [#allocation6]  }
  0x23   :  { %190 = dma.done.wait [#allocation3], 64  }
  0x24   :  { %191 = vsyncadd [#allocation3], 4294967232 }
  0x25   :  { %192 = dma.done.wait [#allocation6], 128  }
  0x26   :  { %193 = vsyncadd [#allocation6], 4294967168  ;;  %v42_v0 = vld [vmem:[#allocation2] sm:$0xf]  ;;  %v44_v1 = vld [vmem:[#allocation5] sm:$0xff]  ;;  %s200_s12 = smov [#allocation8]  }
  0x27   :  { %v43_v2 = vunpack.c.l.bf16 %v42_v0  ;;  %s81_s13 = sshll.u32 %s200_s12, 4  ;;  %s82_s13 = int_to_ptr.vmem [resolvable:$true] %s81_s13 }
  0x28   :  { %s146_s14 = scalar_lea.vmem %s82_s13, 128  ;;  %p151_p3 = scmp.lt.s32.totalorder %s82_s13, %s82_s13 }
  0x29   :  { %v45_v3 = vadd.f32 %v44_v1, %v43_v2  ;;  %p147_p2 = scmp.ne.s32.totalorder %s82_s13, %s146_s14  ;;  %p152_p4 = scmp.lt.s32.totalorder %s146_s14, %s146_s14 }
  0x2b   :  { %v47_v4 = vmul.f32 %v45_v3, %v45_v3  ;;  %46 = vst [vmem:[#allocation8] sm:$0xff] %v45_v3  ;;  %p153_p5 = por %p152_p4, %p151_p3 }
  0x2d   :  { %48 = vadd.xlane.f32.xlu0 %v47_v4  ;;  %p154_p6 = pnand %p153_p5, %p147_p2 }
  0x2f   :  { %157 = shalt.err (!%p154_p6)
}
  0x30   :  { %s158_s16 = scalar_lea.hbm %s282_s4, 128 }
  0x31   :  { %p159_p7 = scmp.ne.s32.totalorder %s282_s4, %s158_s16  ;;  %p162_p8 = scmp.lt.u32.totalorder %s158_s16, %s282_s4 }
  0x33   :  { %p164_p9 = pnand %p162_p8, %p159_p7 }
  0x35   :  { %167 = shalt.err (!%p164_p9)
}
  0x36   :  { %84 = dma.vmem_to_hbm [thread:$0]  %s82_s13, 128, %s282_s4, [#allocation9]   ;;  %v95_v9 = vld [vmem:[%s280_s2] ss:$0 sm:$0xff] }
  0x37   :  { %s201_s25 = smov [#allocation7]  }
  0x38   :  { %s71_s26 = sshll.u32 %s201_s25, 4  ;;  %s72_s26 = int_to_ptr.vmem [resolvable:$true] %s71_s26 }
  0x39   :  { %s168_s27 = scalar_lea.vmem %s72_s26, 64  ;;  %p173_p11 = scmp.lt.s32.totalorder %s72_s26, %s72_s26 }
  0x3a   :  { %p169_p10 = scmp.ne.s32.totalorder %s72_s26, %s168_s27  ;;  %p174_p12 = scmp.lt.s32.totalorder %s168_s27, %s168_s27 }
  0x3c   :  { %p175_p13 = por %p174_p12, %p173_p11 }
  0x3e   :  { %p176_p0 = pnand %p175_p13, %p169_p10 }
  0xba   :  { %v49_v5 = vpop.xlane.xlu0 %48 }
  0xbb   :  { %v51_v6 = vmul.f32 0.0078125, %v49_v5 }
  0xbd   :  { %v52_v7 = vadd.f32 1e-06, %v51_v6 }
  0xbf   :  { %100 = vrsqrt.f32 %v52_v7 }
  0xc9   :  { %v101_v8 = vpop.eup %100 }
  0xca   :  { %v54_v10 = vmul.f32 %v101_v8, %v45_v3 }
  0xcc   :  { %v62_v11 = vmul.f32 %v95_v9, %v54_v10 }
  0xce   :  { %v63_v12 = vpack.c.bf16 %v62_v11, %v62_v11 }
  0xd0   :  { %64 = vst [vmem:[#allocation7] sm:$0xf] %v63_v12 }
  0xd1   :  { %179 = shalt.err (!%p176_p0)
}
  0xd2   :  { %s180_s29 = scalar_lea.hbm %s281_s3, 64 }
  0xd3   :  { %p181_p1 = scmp.ne.s32.totalorder %s281_s3, %s180_s29  ;;  %p184_p2 = scmp.lt.u32.totalorder %s180_s29, %s281_s3 }
  0xd5   :  { %p186_p3 = pnand %p184_p2, %p181_p1 }
  0xd7   :  { %189 = shalt.err (!%p186_p3)
}
  0xd8   :  { %74 = dma.vmem_to_hbm [thread:$0]  %s72_s26, 64, %s281_s3, [#allocation4]  }
  0xd9   :  { %194 = dma.done.wait [#allocation4], 64  }
  0xda   :  { %195 = vsyncadd [#allocation4], 4294967232 }
  0xdb   :  { %196 = dma.done.wait [#allocation9], 128  }
  0xdc   :  { %197 = vsyncadd [#allocation9], 4294967168 }
  0xdd   :  { %91 = vsyncpa [#allocation3], 1 }
  0xde   :  { %92 = vsyncpa [#allocation6], 1 }
  0xdf   :  { %93 = vsyncpa [#allocation4], 1 }
  0xe0   :  { %94 = vsyncpa [#allocation9], 1 }

</bundles_post_ra>
